<compile_context>
chip_gen: v7x
topology: tpu7x:2x2x1
jax: 0.10.0
libtpu: 0.0.40
codegen_flags: <defaults>
</compile_context>

<pallas_src>
import functools

import jax
import jax.numpy as jnp
from jax.experimental import pallas as pl
from jax.experimental.pallas import tpu as pltpu


def _maxpool3x3_kernel(cid_ref, x_ref, o_ref, *, H, W, pad_val):
    """3x3 / stride-1 / pad-1 max pool over one block of flattened planes.

    cid_ref: (1, H*W) int32, column index (0..W-1) of every flattened position.
    x_ref:   (TB, H*W) input planes (H*W is the lane-dense minor dim).
    o_ref:   (TB, H*W) pooled output.
    """
    HW = H * W
    x = x_ref[...]

    # Tiny per-position index rows (all (1, HW); negligible next to the data tile).
    cid = cid_ref[...]                                       # column index
    flat = jax.lax.broadcasted_iota(jnp.int32, (1, HW), 1)   # flattened index
    row_w = flat - cid                                       # row index * W

    def masked_shift(data, shift, *, horizontal):
        """Cyclically rotate `data` along the flattened plane axis; every element that
        is NOT a genuine 3x3-window neighbour of the position it landed on is replaced
        by the padding value, which can never win the max (PyTorch pad semantics).

        The validity mask is built by rotating the index rows with the *same*
        primitive/shift as the data, so it is exact at every row/column edge and is
        independent of the hardware rotate-direction convention.
        """
        shift = shift % HW
        s_cid = pltpu.roll(cid, shift, axis=1)
        s_row_w = pltpu.roll(flat, shift, axis=1) - s_cid     # source row * W
        if horizontal:     # want: same row, adjacent column
            d = s_cid - cid
            ok = (s_row_w == row_w) & ((d == 1) | (d == -1))
        else:              # want: adjacent row (shift is a multiple of W -> same column)
            d = s_row_w - row_w
            ok = (d == W) | (d == -W)
        ok_full = jnp.broadcast_to(ok.astype(jnp.int32), data.shape) != 0
        return jnp.where(ok_full, pltpu.roll(data, shift, axis=1), pad_val)

    # Separable 3x3 max: 3-way max along W (lane shifts +/-1), then along H (+/-W rows).
    col = jnp.maximum(jnp.maximum(masked_shift(x, 1, horizontal=True), x),
                      masked_shift(x, HW - 1, horizontal=True))
    out = jnp.maximum(jnp.maximum(masked_shift(col, W, horizontal=False), col),
                      masked_shift(col, HW - W, horizontal=False))
    o_ref[...] = out.astype(o_ref.dtype)


def _pick_block_planes(num_planes, hw, itemsize, target_bytes=2 << 20):
    """Plane-block size: ~2 MiB input tile (dtype-aware), a multiple of 8 sublanes
    unless the block covers every plane. 2 MiB double-buffered in+out tiles stay far
    inside every generation's VMEM (incl. v5e's 16 MiB scoped default and v7x's 64 MiB
    physical) while sitting at the measured HBM-roofline sweet spot (1-4 MiB)."""
    # TODO(synk): planes so large that even 8 of them overflow VMEM would need extra
    # intra-plane (row) tiling with a halo; not needed for typical CNN feature maps.
    tb = max(1, target_bytes // (hw * itemsize))
    if tb >= num_planes:
        if num_planes >= 16:
            # The whole problem fits one block; still split it so the "parallel" plane
            # axis can shard across the two v7x TensorCores.
            half = (num_planes + 1) // 2
            return ((half + 7) // 8) * 8
        return num_planes
    return max(8, (tb // 8) * 8)


def maxpool3x3(x_nchw, *, block_planes=None):
    """PyTorch nn.MaxPool2d(kernel_size=3, stride=1, padding=1) forward. NCHW -> NCHW."""
    N, C, H, W = x_nchw.shape
    B, HW = N * C, H * W
    dtype = x_nchw.dtype

    if jnp.issubdtype(dtype, jnp.floating):
        pad_val = float("-inf")                 # max-pool padding never wins the max
    elif jnp.issubdtype(dtype, jnp.integer):
        pad_val = int(jnp.iinfo(dtype).min)
    else:
        raise TypeError(f"unsupported dtype: {dtype}")

    # Free metadata reshape: planes stay contiguous; H*W becomes the lane-dense minor dim.
    x2d = x_nchw.reshape(B, HW)
    # Column index of every flattened position (tiny; avoids vector integer div/mod on
    # the VPU). Its block index is constant, so Pallas keeps re-using the same copy.
    col_ids = jnp.tile(jnp.arange(W, dtype=jnp.int32), H).reshape(1, HW)

    itemsize = x_nchw.dtype.itemsize
    tb = block_planes if block_planes is not None else _pick_block_planes(B, HW, itemsize)
    assert tb == B or tb % 8 == 0, "block_planes must be a multiple of 8 or equal N*C"
    num_blocks = pl.cdiv(B, tb)                 # ragged last block is masked by Pallas

    kernel = functools.partial(_maxpool3x3_kernel, H=H, W=W, pad_val=pad_val)
    out2d = pl.pallas_call(
        kernel,
        out_shape=jax.ShapeDtypeStruct((B, HW), dtype),
        grid=(num_blocks,),
        in_specs=[
            pl.BlockSpec((1, HW), lambda i: (0, 0)),     # column-index row
            pl.BlockSpec((tb, HW), lambda i: (i, 0)),    # input planes
        ],
        out_specs=pl.BlockSpec((tb, HW), lambda i: (i, 0)),
        compiler_params=pltpu.CompilerParams(
            dimension_semantics=("parallel",),           # independent planes -> both TCs
            vmem_limit_bytes=32 * 1024 * 1024,           # explicit (v5e default is 16 MiB)
        ),
        cost_estimate=pl.CostEstimate(
            flops=8 * B * HW,                            # 4 maxima + 4 selects / element
            transcendentals=0,
            bytes_accessed=2 * B * HW * itemsize + 4 * HW,
        ),
    )(col_ids, x2d)
    return out2d.reshape(N, C, H, W)


def _reference(x_nchw):
    """Pure-JAX reference matching nn.MaxPool2d(3, stride=1, padding=1)."""
    return jax.lax.reduce_window(
        x_nchw, jnp.array(-jnp.inf, x_nchw.dtype), jax.lax.max,
        window_dimensions=(1, 1, 3, 3),
        window_strides=(1, 1, 1, 1),
        padding=((0, 0), (0, 0), (1, 1), (1, 1)))


if __name__ == "__main__":
    key1, key2 = jax.random.split(jax.random.PRNGKey(0))

    # Nominal small shape from the module: (N, C, H, W) = (2, 4, 16, 16), float32.
    x1 = jax.random.normal(key1, (2, 4, 16, 16), dtype=jnp.float32)
    out1 = jax.block_until_ready(maxpool3x3(x1))
    assert out1.shape == x1.shape
    assert jnp.allclose(out1, _reference(x1)), "f32 mismatch vs reduce_window reference"

    # bf16 with N*C = 15 (not a multiple of the block): exercises native-bf16 handling
    # (half the HBM bytes) and the ragged cdiv grid / multi-step pipelined path.
    x2 = jax.random.normal(key2, (3, 5, 8, 16), dtype=jnp.bfloat16)
    out2 = jax.block_until_ready(maxpool3x3(x2, block_planes=8))
    ref2 = _reference(x2)
    assert out2.shape == x2.shape
    assert jnp.allclose(out2.astype(jnp.float32), ref2.astype(jnp.float32)), \
        "bf16 mismatch vs reduce_window reference"

    print("KERNEL_OK")
</pallas_src>

<mosaic_0001>
module attributes {stable_mosaic.version = 11 : i64} {
  func.func @_maxpool3x3_kernel(%arg0: i32, %arg1: memref<1x256xi32, #tpu.memory_space<vmem>>, %arg2: memref<8x256xf32, #tpu.memory_space<vmem>>, %arg3: memref<8x256xf32, #tpu.memory_space<vmem>>) attributes {dimension_semantics = [#tpu.dimension_semantics<parallel>], iteration_bounds = array<i64: 1>, scalar_prefetch = 0 : i64, scratch_operands = 0 : i64, tpu.core_type = #tpu.core_type<tc>, window_params = [{pipeline_mode = #tpu.pipeline_mode<synchronous>, transform_indices = @transform_0, window_bounds = array<i64: 1, 256>}, {transform_indices = @transform_1, window_bounds = array<i64: 8, 256>}, {transform_indices = @transform_2, window_bounds = array<i64: 8, 256>}]} {
    %c0 = arith.constant 0 : index
    %c0_0 = arith.constant 0 : index
    %0 = vector.load %arg2[%c0, %c0_0] : memref<8x256xf32, #tpu.memory_space<vmem>>, vector<8x256xf32>
    %c0_1 = arith.constant 0 : index
    %c0_2 = arith.constant 0 : index
    %1 = vector.load %arg1[%c0_1, %c0_2] : memref<1x256xi32, #tpu.memory_space<vmem>>, vector<1x256xi32>
    %2 = tpu.iota {dimensions = array<i32: 1>} : vector<1x256xi32>
    %3 = arith.subi %2, %1 : vector<1x256xi32>
    %c1_i32 = arith.constant 1 : i32
    %4 = tpu.dynamic_rotate %1 by %c1_i32 dim 1 : vector<1x256xi32>, i32 -> vector<1x256xi32>
    %c1_i32_3 = arith.constant 1 : i32
    %5 = tpu.dynamic_rotate %2 by %c1_i32_3 dim 1 : vector<1x256xi32>, i32 -> vector<1x256xi32>
    %6 = arith.subi %5, %4 : vector<1x256xi32>
    %7 = arith.subi %4, %1 : vector<1x256xi32>
    %8 = arith.cmpi eq, %6, %3 : vector<1x256xi32>
    %c1_i32_4 = arith.constant 1 : i32
    %9 = vector.broadcast %c1_i32_4 : i32 to vector<1x256xi32>
    %10 = arith.cmpi eq, %7, %9 : vector<1x256xi32>
    %c-1_i32 = arith.constant -1 : i32
    %11 = vector.broadcast %c-1_i32 : i32 to vector<1x256xi32>
    %12 = arith.cmpi eq, %7, %11 : vector<1x256xi32>
    %13 = arith.ori %10, %12 : vector<1x256xi1>
    %14 = arith.andi %8, %13 : vector<1x256xi1>
    %15 = arith.extui %14 : vector<1x256xi1> to vector<1x256xi32>
    %16 = vector.shape_cast %15 : vector<1x256xi32> to vector<1x256xi32>
    %17 = vector.broadcast %16 : vector<1x256xi32> to vector<8x256xi32>
    %c0_i32 = arith.constant 0 : i32
    %18 = vector.broadcast %c0_i32 : i32 to vector<8x256xi32>
    %19 = arith.cmpi ne, %17, %18 : vector<8x256xi32>
    %c1_i32_5 = arith.constant 1 : i32
    %20 = tpu.dynamic_rotate %0 by %c1_i32_5 dim 1 : vector<8x256xf32>, i32 -> vector<8x256xf32>
    %cst = arith.constant 0xFF800000 : f32
    %21 = vector.broadcast %cst : f32 to vector<8x256xf32>
    %22 = arith.select %19, %20, %21 : vector<8x256xi1>, vector<8x256xf32>
    %23 = arith.maximumf %22, %0 : vector<8x256xf32>
    %c255_i32 = arith.constant 255 : i32
    %24 = tpu.dynamic_rotate %1 by %c255_i32 dim 1 : vector<1x256xi32>, i32 -> vector<1x256xi32>
    %c255_i32_6 = arith.constant 255 : i32
    %25 = tpu.dynamic_rotate %2 by %c255_i32_6 dim 1 : vector<1x256xi32>, i32 -> vector<1x256xi32>
    %26 = arith.subi %25, %24 : vector<1x256xi32>
    %27 = arith.subi %24, %1 : vector<1x256xi32>
    %28 = arith.cmpi eq, %26, %3 : vector<1x256xi32>
    %c1_i32_7 = arith.constant 1 : i32
    %29 = vector.broadcast %c1_i32_7 : i32 to vector<1x256xi32>
    %30 = arith.cmpi eq, %27, %29 : vector<1x256xi32>
    %c-1_i32_8 = arith.constant -1 : i32
    %31 = vector.broadcast %c-1_i32_8 : i32 to vector<1x256xi32>
    %32 = arith.cmpi eq, %27, %31 : vector<1x256xi32>
    %33 = arith.ori %30, %32 : vector<1x256xi1>
    %34 = arith.andi %28, %33 : vector<1x256xi1>
    %35 = arith.extui %34 : vector<1x256xi1> to vector<1x256xi32>
    %36 = vector.shape_cast %35 : vector<1x256xi32> to vector<1x256xi32>
    %37 = vector.broadcast %36 : vector<1x256xi32> to vector<8x256xi32>
    %c0_i32_9 = arith.constant 0 : i32
    %38 = vector.broadcast %c0_i32_9 : i32 to vector<8x256xi32>
    %39 = arith.cmpi ne, %37, %38 : vector<8x256xi32>
    %c255_i32_10 = arith.constant 255 : i32
    %40 = tpu.dynamic_rotate %0 by %c255_i32_10 dim 1 : vector<8x256xf32>, i32 -> vector<8x256xf32>
    %cst_11 = arith.constant 0xFF800000 : f32
    %41 = vector.broadcast %cst_11 : f32 to vector<8x256xf32>
    %42 = arith.select %39, %40, %41 : vector<8x256xi1>, vector<8x256xf32>
    %43 = arith.maximumf %23, %42 : vector<8x256xf32>
    %c16_i32 = arith.constant 16 : i32
    %44 = tpu.dynamic_rotate %1 by %c16_i32 dim 1 : vector<1x256xi32>, i32 -> vector<1x256xi32>
    %c16_i32_12 = arith.constant 16 : i32
    %45 = tpu.dynamic_rotate %2 by %c16_i32_12 dim 1 : vector<1x256xi32>, i32 -> vector<1x256xi32>
    %46 = arith.subi %45, %44 : vector<1x256xi32>
    %47 = arith.subi %46, %3 : vector<1x256xi32>
    %c16_i32_13 = arith.constant 16 : i32
    %48 = vector.broadcast %c16_i32_13 : i32 to vector<1x256xi32>
    %49 = arith.cmpi eq, %47, %48 : vector<1x256xi32>
    %c-16_i32 = arith.constant -16 : i32
    %50 = vector.broadcast %c-16_i32 : i32 to vector<1x256xi32>
    %51 = arith.cmpi eq, %47, %50 : vector<1x256xi32>
    %52 = arith.ori %49, %51 : vector<1x256xi1>
    %53 = arith.extui %52 : vector<1x256xi1> to vector<1x256xi32>
    %54 = vector.shape_cast %53 : vector<1x256xi32> to vector<1x256xi32>
    %55 = vector.broadcast %54 : vector<1x256xi32> to vector<8x256xi32>
    %c0_i32_14 = arith.constant 0 : i32
    %56 = vector.broadcast %c0_i32_14 : i32 to vector<8x256xi32>
    %57 = arith.cmpi ne, %55, %56 : vector<8x256xi32>
    %c16_i32_15 = arith.constant 16 : i32
    %58 = tpu.dynamic_rotate %43 by %c16_i32_15 dim 1 : vector<8x256xf32>, i32 -> vector<8x256xf32>
    %cst_16 = arith.constant 0xFF800000 : f32
    %59 = vector.broadcast %cst_16 : f32 to vector<8x256xf32>
    %60 = arith.select %57, %58, %59 : vector<8x256xi1>, vector<8x256xf32>
    %61 = arith.maximumf %60, %43 : vector<8x256xf32>
    %c240_i32 = arith.constant 240 : i32
    %62 = tpu.dynamic_rotate %1 by %c240_i32 dim 1 : vector<1x256xi32>, i32 -> vector<1x256xi32>
    %c240_i32_17 = arith.constant 240 : i32
    %63 = tpu.dynamic_rotate %2 by %c240_i32_17 dim 1 : vector<1x256xi32>, i32 -> vector<1x256xi32>
    %64 = arith.subi %63, %62 : vector<1x256xi32>
    %65 = arith.subi %64, %3 : vector<1x256xi32>
    %c16_i32_18 = arith.constant 16 : i32
    %66 = vector.broadcast %c16_i32_18 : i32 to vector<1x256xi32>
    %67 = arith.cmpi eq, %65, %66 : vector<1x256xi32>
    %c-16_i32_19 = arith.constant -16 : i32
    %68 = vector.broadcast %c-16_i32_19 : i32 to vector<1x256xi32>
    %69 = arith.cmpi eq, %65, %68 : vector<1x256xi32>
    %70 = arith.ori %67, %69 : vector<1x256xi1>
    %71 = arith.extui %70 : vector<1x256xi1> to vector<1x256xi32>
    %72 = vector.shape_cast %71 : vector<1x256xi32> to vector<1x256xi32>
    %73 = vector.broadcast %72 : vector<1x256xi32> to vector<8x256xi32>
    %c0_i32_20 = arith.constant 0 : i32
    %74 = vector.broadcast %c0_i32_20 : i32 to vector<8x256xi32>
    %75 = arith.cmpi ne, %73, %74 : vector<8x256xi32>
    %c240_i32_21 = arith.constant 240 : i32
    %76 = tpu.dynamic_rotate %43 by %c240_i32_21 dim 1 : vector<8x256xf32>, i32 -> vector<8x256xf32>
    %cst_22 = arith.constant 0xFF800000 : f32
    %77 = vector.broadcast %cst_22 : f32 to vector<8x256xf32>
    %78 = arith.select %75, %76, %77 : vector<8x256xi1>, vector<8x256xf32>
    %79 = arith.maximumf %61, %78 : vector<8x256xf32>
    %c0_23 = arith.constant 0 : index
    %c0_24 = arith.constant 0 : index
    %80 = vector.load %arg3[%c0_23, %c0_24] : memref<8x256xf32, #tpu.memory_space<vmem>>, vector<8x256xf32>
    tpu.vector_store %arg3[%c0_23, %c0_24], %79 {strides = array<i32>} : memref<8x256xf32, #tpu.memory_space<vmem>>, vector<8x256xf32>,
    return
  }
  func.func @transform_0(%arg0: i32) -> (i32, i32) {
    %c0_i32 = arith.constant 0 : i32
    %c0_i32_0 = arith.constant 0 : i32
    %c0_i32_1 = arith.constant 0 : i32
    return %c0_i32, %c0_i32_0 : i32, i32
  }
  func.func @transform_1(%arg0: i32) -> (i32, i32) {
    %c0_i32 = arith.constant 0 : i32
    %c0_i32_0 = arith.constant 0 : i32
    return %arg0, %c0_i32 : i32, i32
  }
  func.func @transform_2(%arg0: i32) -> (i32, i32) {
    %c0_i32 = arith.constant 0 : i32
    %c0_i32_0 = arith.constant 0 : i32
    return %arg0, %c0_i32 : i32, i32
  }
}

</mosaic_0001>

<bundles_post_ra>
// kernel: tpu_custom_call.1
= control target key start
LH: loop header
LB: loop body
LE: loop exit
PB: predicated region body
PF: predicated region fallthrough
CT: control target
= control target key end

     0   :  { %7 = vsyncpa [#allocation3], 0  ;;  %s546_s0 = inlined_call_operand.hbm [shape: s32[1,256], index: 0, kind: input, shape index: {}]   ;;  %s547_s1 = inlined_call_operand.hbm [shape: f32[8,256], index: 1, kind: input, shape index: {}]   ;;  %s548_s2 = inlined_call_operand.hbm [shape: f32[8,256], index: 2, kind: output, shape index: {}]  }
   0x1   :  { %8 = vsyncpa [#allocation6], 0 }
   0x2   :  { %9 = vsyncpa [#allocation4], 0  ;;  %s338_s9 = smov [#allocation2]   ;;  %s339_s11 = smov [#allocation5]  }
   0x3   :  { %s16_s10 = sshll.u32 %s338_s9, 4  ;;  %s26_s12 = sshll.u32 %s339_s11, 4  ;;  %s17_s10 = int_to_ptr.vmem [resolvable:$true] %s16_s10  ;;  %s27_s12 = int_to_ptr.vmem [resolvable:$true] %s26_s12 }
   0x4   :  { %s266_s15 = scalar_lea.hbm %s546_s0, 32 }
   0x5   :  { %p267_p0 = scmp.ne.s32.totalorder %s546_s0, %s266_s15  ;;  %p270_p1 = scmp.lt.u32.totalorder %s266_s15, %s546_s0 }
   0x7   :  { %p272_p2 = pnand %p270_p1, %p267_p0 }
   0x9   :  { %275 = shalt.err (!%p272_p2)
}
   0xa   :  { %s276_s20 = scalar_lea.vmem %s17_s10, 32  ;;  %p281_p4 = scmp.lt.s32.totalorder %s17_s10, %s17_s10 }
   0xb   :  { %p277_p3 = scmp.ne.s32.totalorder %s17_s10, %s276_s20  ;;  %p282_p5 = scmp.lt.s32.totalorder %s276_s20, %s276_s20 }
   0xd   :  { %p283_p6 = por %p282_p5, %p281_p4 }
   0xf   :  { %p284_p7 = pnand %p283_p6, %p277_p3 }
  0x11   :  { %287 = shalt.err (!%p284_p7)
}
  0x12   :  { %19 = dma.hbm_to_vmem [thread:$0]  %s546_s0, 32, %s17_s10, [#allocation3]  }
  0x13   :  { %s288_s25 = scalar_lea.hbm %s547_s1, 256 }
  0x14   :  { %p289_p8 = scmp.ne.s32.totalorder %s547_s1, %s288_s25  ;;  %p292_p9 = scmp.lt.u32.totalorder %s288_s25, %s547_s1 }
  0x16   :  { %p294_p10 = pnand %p292_p9, %p289_p8 }
  0x18   :  { %297 = shalt.err (!%p294_p10)
}
  0x19   :  { %s298_s30 = scalar_lea.vmem %s27_s12, 256  ;;  %p303_p12 = scmp.lt.s32.totalorder %s27_s12, %s27_s12 }
  0x1a   :  { %p299_p11 = scmp.ne.s32.totalorder %s27_s12, %s298_s30  ;;  %p304_p13 = scmp.lt.s32.totalorder %s298_s30, %s298_s30 }
  0x1c   :  { %p305_p0 = por %p304_p13, %p303_p12 }
  0x1e   :  { %p306_p1 = pnand %p305_p0, %p299_p11 }
  0x20   :  { %309 = shalt.err (!%p306_p1)
}
  0x21   :  { %29 = dma.hbm_to_vmem [thread:$0]  %s547_s1, 256, %s27_s12, [#allocation6]  }
  0x22   :  { %332 = dma.done.wait [#allocation3], 32  }
  0x23   :  { %333 = vsyncadd [#allocation3], 4294967264 }
  0x24   :  { %334 = dma.done.wait [#allocation6], 256  }
  0x25   :  { %335 = vsyncadd [#allocation6], 4294967040  ;;  %v39_v0 = vlaneseq  ;;  %s340_s4 = smov 1   ;;  %v38_v6 = vld [vmem:[#allocation2] sm:$0x3]  ;;  %s341_s1 = smov 127  }
  0x26   :  { %v392_v9 = vld [vmem:[#allocation5 + $0x8] sm:$0xff]  ;;  %v396_v10 = vld [vmem:[#allocation5] sm:$0xff]  ;;  %s342_s5 = smov 16   ;;  %s343_s6 = smov 112   ;;  %v344_v39 = vmov 0  }
  0x27   :  { %v385_v1 = vand.u32 127, %v39_v0  ;;  %v43_v2 = vshrl.u32 %v39_v0, 7  ;;  %s345_s7 = smov [#allocation7]  }
  0x28   :  { %s248_s8 = sshll.u32 %s345_s7, 4  ;;  %s249_s8 = int_to_ptr.vmem [resolvable:$true] %s248_s8 }
  0x29   :  { %v387_v3 = vsub.s32 0, %v43_v2  ;;  %59 = vrot.lane.b32.xlu1 %v385_v1, %s340_s4  ;;  %v41_v4 = vadd.s32 128, %v385_v1  ;;  %v48_v5 = vsub.s32 1, %v43_v2  ;;  %vm56_vm0 = vcmp.lt.s32.totalorder %v385_v1, 1  ;;  %s310_s9 = scalar_lea.vmem %s249_s8, 256  ;;  %p315_p3 = scmp.lt.s32.totalorder %s249_s8, %s249_s8 }
  0x2a   :  { %vm105_vm1 = vcmp.lt.s32.totalorder %v385_v1, 127  ;;  %p311_p2 = scmp.ne.s32.totalorder %s249_s8, %s310_s9  ;;  %p316_p4 = scmp.lt.s32.totalorder %s310_s9, %s310_s9 }
  0x2b   :  { %v45_v7 = vrot.slane %v38_v6, %v387_v3  ;;  %v49_v8 = vrot.slane %v38_v6, %v48_v5 }
  0x2c   :  { %p317_p5 = por %p316_p4, %p315_p3 }
  0x2d   :  { %61 = vrot.lane.b32.xlu1 %v41_v4, %s340_s4  ;;  %52 = vrot.lane.b32.xlu0 %v45_v7, %s340_s4  ;;  %v412_v15 = vsub.s32 %v41_v4, %v49_v8  ;;  %v415_v17 = vsub.s32 %v385_v1, %v45_v7 }
  0x2e   :  { %p318_p6 = pnand %p317_p5, %p311_p2 }
  0x31   :  { %103 = vrot.lane.b32.xlu1 %v49_v8, %s341_s1  ;;  %54 = vrot.lane.b32.xlu0 %v49_v8, %s340_s4 }
  0x35   :  { %110 = vrot.lane.b32.xlu1 %v41_v4, %s341_s1  ;;  %101 = vrot.lane.b32.xlu0 %v45_v7, %s341_s1 }
  0x39   :  { %93 = vrot.lane.b32.xlu1 %v392_v9, %s340_s4  ;;  %108 = vrot.lane.b32.xlu0 %v385_v1, %s341_s1 }
  0x3d   :  { %142 = vrot.lane.b32.xlu1 %v392_v9, %s341_s1  ;;  %91 = vrot.lane.b32.xlu0 %v396_v10, %s340_s4 }
  0x41   :  { %152 = vrot.lane.b32.xlu1 %v49_v8, %s342_s5  ;;  %140 = vrot.lane.b32.xlu0 %v396_v10, %s341_s1 }
  0x45   :  { %159 = vrot.lane.b32.xlu1 %v41_v4, %s342_s5  ;;  %150 = vrot.lane.b32.xlu0 %v45_v7, %s342_s5 }
  0x49   :  { %197 = vrot.lane.b32.xlu1 %v49_v8, %s343_s6  ;;  %157 = vrot.lane.b32.xlu0 %v385_v1, %s342_s5 }
  0x4d   :  { %204 = vrot.lane.b32.xlu1 %v41_v4, %s343_s6  ;;  %195 = vrot.lane.b32.xlu0 %v45_v7, %s343_s6 }
  0x51   :  { %202 = vrot.lane.b32.xlu0 %v385_v1, %s343_s6 }
  0x9b   :  { %v60_v11 = vpop.permute.xlu1 %59 }
  0x9f   :  { %v62_v12 = vpop.permute.xlu1 %61  ;;  %v53_v13 = vpop.permute.xlu0 %52 }
  0xa0   :  { %v63_v18 = vsel %vm56_vm0, %v60_v11, %v62_v12  ;;  %v64_v19 = vsel %vm56_vm0, %v62_v12, %v60_v11 }
  0xa3   :  { %v104_v14 = vpop.permute.xlu1 %103  ;;  %v55_v16 = vpop.permute.xlu0 %54 }
  0xa4   :  { %v57_v20 = vsel %vm56_vm0, %v53_v13, %v55_v16  ;;  %v58_v21 = vsel %vm56_vm0, %v55_v16, %v53_v13 }
  0xa5   :  { %v65_v22 = vsub.s32 %v64_v19, %v58_v21  ;;  %v66_v23 = vsub.s32 %v63_v18, %v57_v20  ;;  %v67_v24 = vsub.s32 %v58_v21, %v45_v7  ;;  %v68_v25 = vsub.s32 %v57_v20, %v49_v8 }
  0xa7   :  { %v111_v26 = vpop.permute.xlu1 %110  ;;  %vm427_vm2 = vcmp.eq.s32.totalorder %v65_v22, %v415_v17  ;;  %vm432_vm3 = vcmp.eq.s32.totalorder %v66_v23, %v412_v15  ;;  %vm71_vm4 = vcmp.eq.s32.totalorder %v67_v24, 1  ;;  %vm72_vm5 = vcmp.eq.s32.totalorder %v68_v25, 1  ;;  %v102_v29 = vpop.permute.xlu0 %101 }
  0xa8   :  { %vm73_vm6 = vcmp.eq.s32.totalorder %v67_v24, 4294967295  ;;  %vm74_vm7 = vcmp.eq.s32.totalorder %v68_v25, 4294967295  ;;  %v106_v30 = vsel %vm105_vm1, %v102_v29, %v104_v14  ;;  %v107_v31 = vsel %vm105_vm1, %v104_v14, %v102_v29 }
  0xa9   :  { %vm440_vm8 = vmor %vm71_vm4, %vm73_vm6  ;;  %v116_v33 = vsub.s32 %v106_v30, %v45_v7  ;;  %v117_v34 = vsub.s32 %v107_v31, %v49_v8 }
  0xaa   :  { %vm76_vm9 = vmor %vm72_vm5, %vm74_vm7 }
  0xab   :  { %v94_v35 = vpop.permute.xlu1 %93  ;;  %vm77_vm10 = vmand %vm427_vm2, %vm440_vm8  ;;  %vm120_vm11 = vcmp.eq.s32.totalorder %v116_v33, 1  ;;  %vm121_vm12 = vcmp.eq.s32.totalorder %v117_v34, 1  ;;  %vm122_vm13 = vcmp.eq.s32.totalorder %v116_v33, 4294967295  ;;  %v109_v36 = vpop.permute.xlu0 %108  ;;  %vm123_vm15 = vcmp.eq.s32.totalorder %v117_v34, 4294967295 }
  0xac   :  { %vm78_vm14 = vmand %vm432_vm3, %vm76_vm9  ;;  %v112_v37 = vsel %vm105_vm1, %v109_v36, %v111_v26  ;;  %v113_v38 = vsel %vm105_vm1, %v111_v26, %v109_v36  ;;  %v79_v40 = vsel %vm77_vm10, 1, %v344_v39 }
  0xad   :  { %v114_v41 = vsub.s32 %v112_v37, %v106_v30  ;;  %v115_v42 = vsub.s32 %v113_v38, %v107_v31  ;;  %v80_v43 = vsel %vm78_vm14, 1, %v344_v39  ;;  %v84_v44 = vrot.slane %v79_v40, %v387_v3  ;;  %vm124_vm2 = vmor %vm120_vm11, %vm122_vm13 }
  0xae   :  { %v88_v46 = vrot.slane %v80_v43, %v387_v3  ;;  %vm125_vm3 = vmor %vm121_vm12, %vm123_vm15  ;;  %vm154_vm11 = vcmp.lt.s32.totalorder %v385_v1, 16 }
  0xaf   :  { %v143_v45 = vpop.permute.xlu1 %142  ;;  %vm118_vm4 = vcmp.eq.s32.totalorder %v114_v41, %v415_v17  ;;  %vm119_vm5 = vcmp.eq.s32.totalorder %v115_v42, %v412_v15  ;;  %v92_v47 = vpop.permute.xlu0 %91  ;;  %vm89_vm7 = vcmp.ne.s32.totalorder %v84_v44, 0 }
  0xb0   :  { %vm126_vm6 = vmand %vm118_vm4, %vm124_vm2  ;;  %vm462_vm8 = vcmp.ne.s32.totalorder %v88_v46, 0  ;;  %v95_v49 = vsel %vm56_vm0, %v92_v47, %v94_v35  ;;  %v96_v50 = vsel %vm56_vm0, %v94_v35, %v92_v47 }
  0xb1   :  { %vm127_vm9 = vmand %vm119_vm5, %vm125_vm3  ;;  %v97_v51 = vsel %vm89_vm7, %v96_v50, -inf  ;;  %v98_v52 = vsel %vm462_vm8, %v95_v49, -inf  ;;  %v128_v53 = vsel %vm126_vm6, 1, %v344_v39 }
  0xb2   :  { %v129_v55 = vsel %vm127_vm9, 1, %v344_v39  ;;  %v133_v56 = vrot.slane %v128_v53, %v387_v3  ;;  %v99_v59 = vmax.f32 %v97_v51, %v396_v10  ;;  %v100_v62 = vmax.f32 %v98_v52, %v392_v9 }
  0xb3   :  { %v153_v54 = vpop.permute.xlu1 %152  ;;  %v137_v57 = vrot.slane %v129_v55, %v387_v3  ;;  %v141_v58 = vpop.permute.xlu0 %140 }
  0xb4   :  { %vm138_vm10 = vcmp.ne.s32.totalorder %v133_v56, 0  ;;  %v144_v60 = vsel %vm105_vm1, %v141_v58, %v143_v45  ;;  %v145_v61 = vsel %vm105_vm1, %v143_v45, %v141_v58  ;;  %vm199_vm1 = vcmp.lt.s32.totalorder %v385_v1, 112 }
  0xb5   :  { %vm139_vm0 = vcmp.ne.s32.totalorder %v137_v57, 0  ;;  %v146_v63 = vsel %vm138_vm10, %v144_v60, -inf }
  0xb6   :  { %v147_v2 = vsel %vm139_vm0, %v145_v61, -inf  ;;  %v482_v4 = vmax.f32 %v99_v59, %v146_v63 }
  0xb7   :  { %v160_v0 = vpop.permute.xlu1 %159  ;;  %v484_v5 = vmax.f32 %v100_v62, %v147_v2  ;;  %v151_v6 = vpop.permute.xlu0 %150 }
  0xb8   :  { %185 = vrot.lane.b32.xlu0 %v482_v4, %s342_s5  ;;  %v155_v7 = vsel %vm154_vm11, %v151_v6, %v153_v54  ;;  %v156_v8 = vsel %vm154_vm11, %v153_v54, %v151_v6 }
  0xb9   :  { %187 = vrot.lane.b32.xlu1 %v484_v5, %s342_s5 }
  0xbb   :  { %v158_v9 = vpop.permute.xlu0 %157  ;;  %v198_v10 = vpop.permute.xlu1 %197 }
  0xbc   :  { %230 = vrot.lane.b32.xlu0 %v482_v4, %s343_s6  ;;  %v161_v11 = vsel %vm154_vm11, %v158_v9, %v160_v0  ;;  %v162_v12 = vsel %vm154_vm11, %v160_v0, %v158_v9 }
  0xbd   :  { %232 = vrot.lane.b32.xlu1 %v484_v5, %s343_s6  ;;  %v163_v13 = vsub.s32 %v162_v12, %v156_v8  ;;  %v164_v14 = vsub.s32 %v161_v11, %v155_v7 }
  0xbf   :  { %v165_v16 = vsub.s32 %v163_v13, %v415_v17  ;;  %v166_v18 = vsub.s32 %v164_v14, %v412_v15  ;;  %v196_v19 = vpop.permute.xlu0 %195  ;;  %v205_v20 = vpop.permute.xlu1 %204 }
  0xc0   :  { %v200_v21 = vsel %vm199_vm1, %v196_v19, %v198_v10  ;;  %v201_v22 = vsel %vm199_vm1, %v198_v10, %v196_v19 }
  0xc1   :  { %vm167_vm12 = vcmp.eq.s32.totalorder %v165_v16, 16  ;;  %vm168_vm13 = vcmp.eq.s32.totalorder %v166_v18, 16  ;;  %vm169_vm14 = vcmp.eq.s32.totalorder %v165_v16, 4294967280  ;;  %vm170_vm15 = vcmp.eq.s32.totalorder %v166_v18, 4294967280 }
  0xc2   :  { %vm171_vm2 = vmor %vm167_vm12, %vm169_vm14 }
  0xc3   :  { %v203_v23 = vpop.permute.xlu0 %202  ;;  %vm172_vm3 = vmor %vm168_vm13, %vm170_vm15  ;;  %v173_v24 = vsel %vm171_vm2, 1, %v344_v39 }
  0xc4   :  { %v206_v25 = vsel %vm199_vm1, %v203_v23, %v205_v20  ;;  %v207_v26 = vsel %vm199_vm1, %v205_v20, %v203_v23  ;;  %v174_v27 = vsel %vm172_vm3, 1, %v344_v39  ;;  %v178_v34 = vrot.slane %v173_v24, %v387_v3 }
  0xc5   :  { %v208_v28 = vsub.s32 %v206_v25, %v200_v21  ;;  %v209_v29 = vsub.s32 %v207_v26, %v201_v22  ;;  %v182_v35 = vrot.slane %v174_v27, %v387_v3 }
  0xc6   :  { %vm183_vm10 = vcmp.ne.s32.totalorder %v178_v34, 0 }
  0xc7   :  { %v210_v30 = vsub.s32 %v208_v28, %v415_v17  ;;  %v211_v31 = vsub.s32 %v209_v29, %v412_v15  ;;  %vm184_vm0 = vcmp.ne.s32.totalorder %v182_v35, 0 }
  0xc9   :  { %vm212_vm4 = vcmp.eq.s32.totalorder %v210_v30, 16  ;;  %vm213_vm5 = vcmp.eq.s32.totalorder %v211_v31, 16  ;;  %vm214_vm6 = vcmp.eq.s32.totalorder %v210_v30, 4294967280  ;;  %vm215_vm7 = vcmp.eq.s32.totalorder %v211_v31, 4294967280 }
  0xca   :  { %vm216_vm8 = vmor %vm212_vm4, %vm214_vm6 }
  0xcb   :  { %vm217_vm9 = vmor %vm213_vm5, %vm215_vm7  ;;  %v218_v32 = vsel %vm216_vm8, 1, %v344_v39 }
  0xcc   :  { %v219_v33 = vsel %vm217_vm9, 1, %v344_v39  ;;  %v223_v17 = vrot.slane %v218_v32, %v387_v3 }
  0xcd   :  { %v227_v15 = vrot.slane %v219_v33, %v387_v3 }
  0xce   :  { %vm228_vm12 = vcmp.ne.s32.totalorder %v223_v17, 0 }
  0xcf   :  { %vm229_vm13 = vcmp.ne.s32.totalorder %v227_v15, 0 }
 0x12a   :  { %v186_v36 = vpop.permute.xlu0 %185 }
 0x12b   :  { %v188_v37 = vpop.permute.xlu1 %187 }
 0x12c   :  { %v189_v38 = vsel %vm154_vm11, %v186_v36, %v188_v37  ;;  %v190_v40 = vsel %vm154_vm11, %v188_v37, %v186_v36 }
 0x12d   :  { %v191_v41 = vsel %vm183_vm10, %v190_v40, -inf  ;;  %v192_v39 = vsel %vm184_vm0, %v189_v38, -inf }
 0x12e   :  { %v231_v42 = vpop.permute.xlu0 %230  ;;  %v193_v44 = vmax.f32 %v191_v41, %v482_v4  ;;  %v194_v3 = vmax.f32 %v192_v39, %v484_v5 }
 0x12f   :  { %v233_v43 = vpop.permute.xlu1 %232 }
 0x130   :  { %v234_v45 = vsel %vm199_vm1, %v231_v42, %v233_v43  ;;  %v235_v46 = vsel %vm199_vm1, %v233_v43, %v231_v42 }
 0x131   :  { %v236_v47 = vsel %vm228_vm12, %v234_v45, -inf  ;;  %v237_v48 = vsel %vm229_vm13, %v235_v46, -inf }
 0x132   :  { %v238_v49 = vmax.f32 %v193_v44, %v236_v47  ;;  %v239_v50 = vmax.f32 %v194_v3, %v237_v48 }
 0x134   :  { %240 = vst [vmem:[#allocation7] sm:$0xff] %v238_v49  ;;  %241 = vst [vmem:[#allocation7 + $0x8] sm:$0xff] %v239_v50 }
 0x135   :  { %321 = shalt.err (!%p318_p6)
}
 0x136   :  { %s322_s12 = scalar_lea.hbm %s548_s2, 256 }
 0x137   :  { %p323_p7 = scmp.ne.s32.totalorder %s548_s2, %s322_s12  ;;  %p326_p8 = scmp.lt.u32.totalorder %s322_s12, %s548_s2 }
 0x139   :  { %p328_p9 = pnand %p326_p8, %p323_p7 }
 0x13b   :  { %331 = shalt.err (!%p328_p9)
}
 0x13c   :  { %251 = dma.vmem_to_hbm [thread:$0]  %s249_s8, 256, %s548_s2, [#allocation4]  }
 0x13d   :  { %336 = dma.done.wait [#allocation4], 256  }
 0x13e   :  { %337 = vsyncadd [#allocation4], 4294967040 }
 0x13f   :  { %255 = vsyncpa [#allocation3], 1 }
 0x140   :  { %256 = vsyncpa [#allocation6], 1 }
 0x141   :  { %257 = vsyncpa [#allocation4], 1 }

</bundles_post_ra>
